<compile_context>
chip_gen: v7x
topology: tpu7x:2x2x1
jax: 0.10.0
libtpu: 0.0.40
codegen_flags: <defaults>
</compile_context>

<pallas_src>
import functools

import jax
import jax.numpy as jnp
from jax.experimental import pallas as pl
from jax.experimental.pallas import tpu as pltpu

_EPS = 1e-5


def _cdiv(a, b):
  return -(-a // b)


def _round_up(a, b):
  return _cdiv(a, b) * b


def _mlp_kernel(x_ref,
                w1_ref, b1_ref,
                w2_ref, b2_ref,
                w3_ref, b3_ref,
                w4_ref, b4_ref,
                o_ref):
  """Fused (Linear -> ReLU)x3 -> row-dot, with eval-mode BN pre-folded."""
  # Layer 1: Linear(D, 512) -> ReLU   (x already bf16; f32 MXU accumulation)
  h = jnp.dot(x_ref[...], w1_ref[...],
              preferred_element_type=jnp.float32) + b1_ref[...]
  h = jnp.maximum(h, 0.0)

  # Layer 2: Linear(512, 256) -> ReLU   (BN1 folded into w2/b2)
  h = jnp.dot(h.astype(jnp.bfloat16), w2_ref[...],
              preferred_element_type=jnp.float32) + b2_ref[...]
  h = jnp.maximum(h, 0.0)

  # Layer 3: Linear(256, 128) -> ReLU   (BN2 folded into w3/b3)
  h = jnp.dot(h.astype(jnp.bfloat16), w3_ref[...],
              preferred_element_type=jnp.float32) + b3_ref[...]
  h = jnp.maximum(h, 0.0)

  # Layer 4: Linear(128, 1) as VPU multiply + lane reduction (BN3 folded in).
  # w4_ref is the [1, 128] folded final-weight row (f32); b4 is an SMEM scalar.
  col = jnp.sum(h * w4_ref[...], axis=-1, keepdims=True) + b4_ref[0]  # [bb, 1]
  # Lane-dense store: transpose (XLU, idle slot) to a [1, block_b] row so the
  # writeback is a single unmasked, lane-dense store instead of bb/8 vst.msk.
  o_ref[...] = col.T.astype(o_ref.dtype)


def _choose_block_b(B, requested=None, *, max_block=2048, target_tiles=2):
  """Adaptive batch tile (static, Python ints).

  Guarantees >=2 tiles when possible (v7x megacore), keeps tiles a multiple of
  8 sublanes (128 MXU M-granule when big), caps at 2048 rows (~10 MiB VMEM
  incl. double buffering -> no vmem_limit_bytes needed on any generation).
  """
  if requested is not None:
    return max(8, int(requested))
  n_tiles = max(target_tiles, _cdiv(B, max_block))
  bb = _cdiv(B, n_tiles)
  granule = 128 if bb >= 512 else 8
  bb = _round_up(bb, granule)
  return max(8, min(max_block, bb))


@functools.partial(jax.jit, static_argnames=("block_b",))
def delay_predictor_forward(x, folded_params, *, block_b=None):
  """x: [B, D] float32. folded_params from fold_params(). Returns [B, 1] f32."""
  B, D = x.shape
  w1, b1, w2, b2, w3, b3, w4_row, b4 = folded_params

  bb = _choose_block_b(B, block_b)
  n_tiles = _cdiv(B, bb)
  B_pad = n_tiles * bb

  # Cast the activation stream to bf16 at the boundary (halves x HBM/DMA
  # bytes and removes the per-tile in-kernel cast), then pad the batch.
  x = x.astype(jnp.bfloat16)
  if B_pad != B:
    x = jnp.pad(x, ((0, B_pad - B), (0, 0)))

  def rep(arr):
    # Full-array parameter block, same block index every grid step -> fetched
    # once and kept resident across the batch tiles.
    return pl.BlockSpec(arr.shape, lambda i: (0, 0))

  in_specs = [
      pl.BlockSpec((bb, D), lambda i: (i, 0)),                   # x, batch-tiled
      rep(w1), rep(b1),
      rep(w2), rep(b2),
      rep(w3), rep(b3),
      rep(w4_row),                                               # [1, 128] f32
      pl.BlockSpec(memory_space=pltpu.MemorySpace.SMEM),         # b4 scalar
  ]
  # Lane-dense output slab: (n_tiles, 1, block_b); each tile writes one
  # [1, block_b] row (leading tile axis squeezed out of the kernel ref).
  out_specs = pl.BlockSpec((None, 1, bb), lambda i: (i, 0, 0))

  flops = 2 * B_pad * (D * 512 + 512 * 256 + 256 * 128 + 128)
  param_bytes = sum(int(a.size) * a.dtype.itemsize for a in folded_params)
  bytes_accessed = B_pad * D * 2 + B_pad * 4 + param_bytes

  out = pl.pallas_call(
      _mlp_kernel,
      out_shape=jax.ShapeDtypeStruct((n_tiles, 1, bb), jnp.float32),
      grid_spec=pltpu.PrefetchScalarGridSpec(
          num_scalar_prefetch=0,
          grid=(n_tiles,),
          in_specs=in_specs,
          out_specs=out_specs,
      ),
      compiler_params=pltpu.CompilerParams(
          dimension_semantics=("parallel",),
      ),
      cost_estimate=pl.CostEstimate(
          flops=flops, transcendentals=0, bytes_accessed=bytes_accessed),
  )(x, w1, b1, w2, b2, w3, b3, w4_row, b4)

  # (n_tiles, 1, bb) -> [B, 1], dropping padded rows.
  return out.reshape(-1)[:B].reshape(B, 1)


def init_params(key, input_dim):
  """Raw PyTorch-style parameters (deterministic, PyTorch-default-like init).

  Returns a list of 4 tuples (W[in,out], b[out], bn) where bn is
  (gamma, beta, running_mean, running_var) for the first three layers, else
  None. BN stats/affine are made non-trivial so folding is actually exercised.
  """
  dims = [input_dim, 512, 256, 128, 1]
  layers = []
  for li in range(4):
    fan_in, fan_out = dims[li], dims[li + 1]
    key, kw, kb = jax.random.split(key, 3)
    bound = 1.0 / (float(fan_in) ** 0.5)
    w = jax.random.uniform(kw, (fan_in, fan_out), jnp.float32, -bound, bound)
    b = jax.random.uniform(kb, (fan_out,), jnp.float32, -bound, bound)
    bn = None
    if li < 3:
      key, kg, kbt, km, kv = jax.random.split(key, 5)
      gamma = jax.random.uniform(kg, (fan_out,), jnp.float32, 0.5, 1.5)
      beta = jax.random.uniform(kbt, (fan_out,), jnp.float32, -0.5, 0.5)
      rmean = jax.random.uniform(km, (fan_out,), jnp.float32, -0.5, 0.5)
      rvar = jax.random.uniform(kv, (fan_out,), jnp.float32, 0.5, 1.5)
      bn = (gamma, beta, rmean, rvar)
    layers.append((w, b, bn))
  return layers


def fold_params(layers, eps=_EPS, mxu_dtype=jnp.bfloat16):
  """Fold each eval-mode BatchNorm affine into the NEXT linear layer.

  BN(relu_out) = relu_out * s + t, with s = gamma/sqrt(var+eps), t = beta - mean*s.
  Then (relu_out*s + t) @ W + b == relu_out @ (s[:,None]*W) + (t @ W + b).
  Weights feeding the MXU are stored bf16; the final 128->1 projection is kept
  as an f32 [1,128] row (consumed by the VPU) plus an SMEM scalar bias.
  """
  (w1, b1, bn1), (w2, b2, bn2), (w3, b3, bn3), (w4, b4, _) = layers

  def affine(bn):
    g, bt, m, v = bn
    s = g / jnp.sqrt(v + eps)
    return s, bt - m * s

  s1, t1 = affine(bn1)
  s2, t2 = affine(bn2)
  s3, t3 = affine(bn3)

  W2 = s1[:, None] * w2
  B2 = b2 + t1 @ w2
  W3 = s2[:, None] * w3
  B3 = b3 + t2 @ w3
  W4 = s3[:, None] * w4            # [128, 1]
  B4 = b4 + t3 @ w4                # [1]

  return (
      w1.astype(mxu_dtype), b1.reshape(1, -1).astype(jnp.float32),
      W2.astype(mxu_dtype), B2.reshape(1, -1).astype(jnp.float32),
      W3.astype(mxu_dtype), B3.reshape(1, -1).astype(jnp.float32),
      W4.T.astype(jnp.float32),    # [1, 128] row for the VPU reduction
      B4.reshape(1).astype(jnp.float32),
  )


def _reference_forward_full(x, layers, eps=_EPS):
  """Pure-JAX f32 reference of the eval-mode PyTorch forward (explicit BN)."""
  h = x
  for (w, b, bn) in layers:
    h = h @ w + b
    if bn is not None:
      h = jnp.maximum(h, 0.0)
      g, bt, m, v = bn
      h = (h - m) * (g / jnp.sqrt(v + eps)) + bt
      # Dropout in eval mode -> identity.
  return h


def _reference_forward_folded(x, folded):
  """Pure-JAX reference with the SAME folded/bf16 structure as the kernel."""
  w1, b1, w2, b2, w3, b3, w4_row, b4 = folded
  h = jnp.maximum(jnp.dot(x.astype(jnp.bfloat16), w1,
                          preferred_element_type=jnp.float32) + b1, 0.0)
  h = jnp.maximum(jnp.dot(h.astype(jnp.bfloat16), w2,
                          preferred_element_type=jnp.float32) + b2, 0.0)
  h = jnp.maximum(jnp.dot(h.astype(jnp.bfloat16), w3,
                          preferred_element_type=jnp.float32) + b3, 0.0)
  return jnp.sum(h * w4_row, axis=-1, keepdims=True) + b4[0]


if __name__ == "__main__":
  key = jax.random.PRNGKey(0)
  input_dim = 32   # number of PCA features (X_train_pca.shape[1])
  batch = 37       # small, ragged -> exercises adaptive tiling (2 tiles of 24 rows)

  key, kx, kp = jax.random.split(key, 3)
  x = jax.random.normal(kx, (batch, input_dim), jnp.float32)
  layers = init_params(kp, input_dim)
  folded = fold_params(layers)

  out = delay_predictor_forward(x, folded)
  out = jax.block_until_ready(out)
  assert out.shape == (batch, 1)

  # Tight check vs. a pure-JAX reference with identical folding / bf16 structure.
  ref_match = _reference_forward_folded(x, folded)
  err_match = float(jnp.max(jnp.abs(out - ref_match)))
  assert err_match < 5e-3, f"mismatch vs matched bf16 reference: {err_match}"

  # Loose check vs. the full-precision, explicit-BN eval-mode reference
  # (tolerance relaxed for bf16 matmul operands).
  ref_full = _reference_forward_full(x, layers)
  scale = float(jnp.max(jnp.abs(ref_full))) + 1.0
  err_full = float(jnp.max(jnp.abs(out - ref_full)))
  assert err_full < 5e-2 * scale, f"mismatch vs f32 eval-mode reference: {err_full}"

  print("KERNEL_OK")
</pallas_src>

<mosaic_0001>
module attributes {stable_mosaic.version = 11 : i64} {
  func.func @_mlp_kernel(%arg0: i32, %arg1: memref<24x32xbf16, #tpu.memory_space<vmem>>, %arg2: memref<32x512xbf16, #tpu.memory_space<vmem>>, %arg3: memref<1x512xf32, #tpu.memory_space<vmem>>, %arg4: memref<512x256xbf16, #tpu.memory_space<vmem>>, %arg5: memref<1x256xf32, #tpu.memory_space<vmem>>, %arg6: memref<256x128xbf16, #tpu.memory_space<vmem>>, %arg7: memref<1x128xf32, #tpu.memory_space<vmem>>, %arg8: memref<1x128xf32, #tpu.memory_space<vmem>>, %arg9: memref<1xf32, #tpu.memory_space<smem>>, %arg10: memref<1x1x24xf32, #tpu.memory_space<vmem>>) attributes {dimension_semantics = [#tpu.dimension_semantics<parallel>], iteration_bounds = array<i64: 2>, scalar_prefetch = 0 : i64, scratch_operands = 0 : i64, tpu.core_type = #tpu.core_type<tc>, window_params = [{transform_indices = @transform_0, window_bounds = array<i64: 24, 32>}, {pipeline_mode = #tpu.pipeline_mode<synchronous>, transform_indices = @transform_1, window_bounds = array<i64: 32, 512>}, {pipeline_mode = #tpu.pipeline_mode<synchronous>, transform_indices = @transform_2, window_bounds = array<i64: 1, 512>}, {pipeline_mode = #tpu.pipeline_mode<synchronous>, transform_indices = @transform_3, window_bounds = array<i64: 512, 256>}, {pipeline_mode = #tpu.pipeline_mode<synchronous>, transform_indices = @transform_4, window_bounds = array<i64: 1, 256>}, {pipeline_mode = #tpu.pipeline_mode<synchronous>, transform_indices = @transform_5, window_bounds = array<i64: 256, 128>}, {pipeline_mode = #tpu.pipeline_mode<synchronous>, transform_indices = @transform_6, window_bounds = array<i64: 1, 128>}, {pipeline_mode = #tpu.pipeline_mode<synchronous>, transform_indices = @transform_7, window_bounds = array<i64: 1, 128>}, {transform_indices = @transform_8, window_bounds = array<i64: 1>}, {transform_indices = @transform_9, window_bounds = array<i64: 1, 1, 24>}]} {
    %c0 = arith.constant 0 : index
    %c0_0 = arith.constant 0 : index
    %0 = vector.load %arg1[%c0, %c0_0] : memref<24x32xbf16, #tpu.memory_space<vmem>>, vector<24x32xbf16>
    %c0_1 = arith.constant 0 : index
    %c0_2 = arith.constant 0 : index
    %1 = vector.load %arg2[%c0_1, %c0_2] : memref<32x512xbf16, #tpu.memory_space<vmem>>, vector<32x512xbf16>
    %cst = arith.constant dense<0.000000e+00> : vector<24x512xf32>
    %2 = tpu.matmul %0, %1, %cst {dimension_numbers = #tpu.dot_dimension_numbers<[1], [0], [0], [1], [0, 0, 1, 1], [], []>} : vector<24x32xbf16>, vector<32x512xbf16>, vector<24x512xf32> -> vector<24x512xf32>
    %c0_3 = arith.constant 0 : index
    %c0_4 = arith.constant 0 : index
    %3 = vector.load %arg3[%c0_3, %c0_4] : memref<1x512xf32, #tpu.memory_space<vmem>>, vector<1x512xf32>
    %4 = vector.broadcast %3 : vector<1x512xf32> to vector<24x512xf32>
    %5 = arith.addf %2, %4 : vector<24x512xf32>
    %cst_5 = arith.constant 0.000000e+00 : f32
    %6 = vector.broadcast %cst_5 : f32 to vector<24x512xf32>
    %7 = arith.maximumf %5, %6 : vector<24x512xf32>
    %8 = arith.truncf %7 : vector<24x512xf32> to vector<24x512xbf16>
    %c0_6 = arith.constant 0 : index
    %c0_7 = arith.constant 0 : index
    %9 = vector.load %arg4[%c0_6, %c0_7] : memref<512x256xbf16, #tpu.memory_space<vmem>>, vector<512x256xbf16>
    %cst_8 = arith.constant dense<0.000000e+00> : vector<24x256xf32>
    %10 = tpu.matmul %8, %9, %cst_8 {dimension_numbers = #tpu.dot_dimension_numbers<[1], [0], [0], [1], [0, 0, 1, 1], [], []>} : vector<24x512xbf16>, vector<512x256xbf16>, vector<24x256xf32> -> vector<24x256xf32>
    %c0_9 = arith.constant 0 : index
    %c0_10 = arith.constant 0 : index
    %11 = vector.load %arg5[%c0_9, %c0_10] : memref<1x256xf32, #tpu.memory_space<vmem>>, vector<1x256xf32>
    %12 = vector.broadcast %11 : vector<1x256xf32> to vector<24x256xf32>
    %13 = arith.addf %10, %12 : vector<24x256xf32>
    %cst_11 = arith.constant 0.000000e+00 : f32
    %14 = vector.broadcast %cst_11 : f32 to vector<24x256xf32>
    %15 = arith.maximumf %13, %14 : vector<24x256xf32>
    %16 = arith.truncf %15 : vector<24x256xf32> to vector<24x256xbf16>
    %c0_12 = arith.constant 0 : index
    %c0_13 = arith.constant 0 : index
    %17 = vector.load %arg6[%c0_12, %c0_13] : memref<256x128xbf16, #tpu.memory_space<vmem>>, vector<256x128xbf16>
    %cst_14 = arith.constant dense<0.000000e+00> : vector<24x128xf32>
    %18 = tpu.matmul %16, %17, %cst_14 {dimension_numbers = #tpu.dot_dimension_numbers<[1], [0], [0], [1], [0, 0, 1, 1], [], []>} : vector<24x256xbf16>, vector<256x128xbf16>, vector<24x128xf32> -> vector<24x128xf32>
    %c0_15 = arith.constant 0 : index
    %c0_16 = arith.constant 0 : index
    %19 = vector.load %arg7[%c0_15, %c0_16] : memref<1x128xf32, #tpu.memory_space<vmem>>, vector<1x128xf32>
    %20 = vector.broadcast %19 : vector<1x128xf32> to vector<24x128xf32>
    %21 = arith.addf %18, %20 : vector<24x128xf32>
    %cst_17 = arith.constant 0.000000e+00 : f32
    %22 = vector.broadcast %cst_17 : f32 to vector<24x128xf32>
    %23 = arith.maximumf %21, %22 : vector<24x128xf32>
    %c0_18 = arith.constant 0 : index
    %c0_19 = arith.constant 0 : index
    %24 = vector.load %arg8[%c0_18, %c0_19] : memref<1x128xf32, #tpu.memory_space<vmem>>, vector<1x128xf32>
    %25 = vector.broadcast %24 : vector<1x128xf32> to vector<24x128xf32>
    %26 = arith.mulf %23, %25 : vector<24x128xf32>
    %cst_20 = arith.constant dense<0.000000e+00> : vector<24xf32>
    %27 = vector.multi_reduction <add>, %26, %cst_20 [1] : vector<24x128xf32> to vector<24xf32>
    %28 = vector.shape_cast %27 : vector<24xf32> to vector<24x1xf32>
    %c0_21 = arith.constant 0 : index
    %29 = memref.load %arg9[%c0_21] : memref<1xf32, #tpu.memory_space<smem>>
    %30 = vector.broadcast %29 : f32 to vector<24x1xf32>
    %31 = arith.addf %28, %30 : vector<24x1xf32>
    %32 = tpu.transpose %31, [1, 0] : vector<24x1xf32> -> vector<1x24xf32>
    %c0_22 = arith.constant 0 : index
    %c0_23 = arith.constant 0 : index
    %c0_24 = arith.constant 0 : index
    %33 = vector.load %arg10[%c0_22, %c0_23, %c0_24] : memref<1x1x24xf32, #tpu.memory_space<vmem>>, vector<1x1x24xf32>
    %34 = vector.shape_cast %33 : vector<1x1x24xf32> to vector<1x24xf32>
    %35 = vector.shape_cast %32 : vector<1x24xf32> to vector<1x1x24xf32>
    tpu.vector_store %arg10[%c0_22, %c0_23, %c0_24], %35 {strides = array<i32>} : memref<1x1x24xf32, #tpu.memory_space<vmem>>, vector<1x1x24xf32>,
    return
  }
  func.func @transform_0(%arg0: i32) -> (i32, i32) {
    %c0_i32 = arith.constant 0 : i32
    %c0_i32_0 = arith.constant 0 : i32
    return %arg0, %c0_i32 : i32, i32
  }
  func.func @transform_1(%arg0: i32) -> (i32, i32) {
    %c0_i32 = arith.constant 0 : i32
    %c0_i32_0 = arith.constant 0 : i32
    %c0_i32_1 = arith.constant 0 : i32
    return %c0_i32, %c0_i32_0 : i32, i32
  }
  func.func @transform_2(%arg0: i32) -> (i32, i32) {
    %c0_i32 = arith.constant 0 : i32
    %c0_i32_0 = arith.constant 0 : i32
    %c0_i32_1 = arith.constant 0 : i32
    return %c0_i32, %c0_i32_0 : i32, i32
  }
  func.func @transform_3(%arg0: i32) -> (i32, i32) {
    %c0_i32 = arith.constant 0 : i32
    %c0_i32_0 = arith.constant 0 : i32
    %c0_i32_1 = arith.constant 0 : i32
    return %c0_i32, %c0_i32_0 : i32, i32
  }
  func.func @transform_4(%arg0: i32) -> (i32, i32) {
    %c0_i32 = arith.constant 0 : i32
    %c0_i32_0 = arith.constant 0 : i32
    %c0_i32_1 = arith.constant 0 : i32
    return %c0_i32, %c0_i32_0 : i32, i32
  }
  func.func @transform_5(%arg0: i32) -> (i32, i32) {
    %c0_i32 = arith.constant 0 : i32
    %c0_i32_0 = arith.constant 0 : i32
    %c0_i32_1 = arith.constant 0 : i32
    return %c0_i32, %c0_i32_0 : i32, i32
  }
  func.func @transform_6(%arg0: i32) -> (i32, i32) {
    %c0_i32 = arith.constant 0 : i32
    %c0_i32_0 = arith.constant 0 : i32
    %c0_i32_1 = arith.constant 0 : i32
    return %c0_i32, %c0_i32_0 : i32, i32
  }
  func.func @transform_7(%arg0: i32) -> (i32, i32) {
    %c0_i32 = arith.constant 0 : i32
    %c0_i32_0 = arith.constant 0 : i32
    %c0_i32_1 = arith.constant 0 : i32
    return %c0_i32, %c0_i32_0 : i32, i32
  }
  func.func @transform_8(%arg0: i32) -> i32 {
    %c0_i32 = arith.constant 0 : i32
    %c0_i32_0 = arith.constant 0 : i32
    return %c0_i32 : i32
  }
  func.func @transform_9(%arg0: i32) -> (i32, i32, i32) {
    %c0_i32 = arith.constant 0 : i32
    %c0_i32_0 = arith.constant 0 : i32
    %c0_i32_1 = arith.constant 0 : i32
    return %arg0, %c0_i32, %c0_i32_0 : i32, i32, i32
  }
}

</mosaic_0001>

<bundles_post_ra>
// kernel: delay_predictor_forward.1
= control target key start
LH: loop header
LB: loop body
LE: loop exit
PB: predicated region body
PF: predicated region fallthrough
CT: control target
= control target key end

     0   :  { %s2004_s0 = inlined_call_operand.vmem [shape: bf16[48,32], index: 0, kind: input, shape index: {}]   ;;  %s2005_s1 = inlined_call_operand.hbm [shape: bf16[32,512], index: 1, kind: input, shape index: {}]   ;;  %s2006_s2 = inlined_call_operand.vmem [shape: f32[1,512], index: 2, kind: input, shape index: {}]   ;;  %s2007_s3 = inlined_call_operand.hbm [shape: bf16[512,256], index: 3, kind: input, shape index: {}]   ;;  %s2008_s4 = inlined_call_operand.vmem [shape: f32[1,256], index: 4, kind: input, shape index: {}]   ;;  %s2009_s5 = inlined_call_operand.vmem [shape: bf16[256,128], index: 5, kind: input, shape index: {}]   ;;  %s2010_s6 = inlined_call_operand.vmem [shape: f32[1,128], index: 6, kind: input, shape index: {}]   ;;  %s2011_s7 = inlined_call_operand.vmem [shape: f32[1,128], index: 7, kind: input, shape index: {}]   ;;  %s2012_s8 = inlined_call_operand.<no memory space> [shape: f32[1], index: 8, kind: input, shape index: {}]   ;;  %s2013_s9 = inlined_call_operand.vmem [shape: f32[2,1,24], index: 9, kind: output, shape index: {}]  }
   0x1   :  { %14 = sst [smem:[#allocation2]] %s2012_s8 }
   0x2   :  { %15 = vsyncpa [#allocation4], 0 }
   0x3   :  { %16 = vsyncpa [#allocation6], 0  ;;  %s1832_s11 = smov 0  }
   0x4 LB: > { %s1772_s12 = smov [#allocation3]   ;;  %s1838_s14 = sadd.s32 4294967295, %s1770_s11   ;;  %s1770_s11 = sphi %s1832_s11, %s22_s11  }
   0x5   : > { %s259_s13 = sshll.u32 %s1772_s12, 4  ;;  %p1393_p0 = scmp.ge.s32.totalorder %s1770_s11, 1  ;;  %s260_s13 = int_to_ptr.vmem [resolvable:$true] %s259_s13 }
   0x6   : > { %p247_p1 = scmp.lt.s32.totalorder %s1770_s11, 3  ;;  %p2014_p3 = scmp.eq.s32.totalorder %s1838_s14, 0 }
   0x7   : > { %s1773_s15 = smov [#allocation5]   ;;  %s1700_s20 = scalar_lea.hbm %s2005_s1, 1024 }
   0x8   : > { %p1842_p2 = pnand %p1393_p0, %p247_p1  ;;  %s275_s16 = sshll.u32 %s1773_s15, 4  ;;  %s1855_s16 = int_to_ptr.vmem [resolvable:$true] %s275_s16 }
   0x9   : > { %p1701_p6 = scmp.ne.s32.totalorder %s2005_s1, %s1700_s20  ;;  %p1707_p10 = scmp.lt.u32.totalorder %s1700_s20, %s2005_s1 }
   0xa   : > { %s2016_s8 = scalar_select %p1842_p2, 1, 0 }
   0xb   : > { %p1547_p4 = pneg %p1842_p2 }
   0xd   : > { %p1851_p5 = pnand %p2014_p3, %p1547_p4 }
   0xf   : > { %p1702_p7 = pneg %p1851_p5 }
  0x11   : > { %p1703_p8 = pnand %p1702_p7, %p1701_p6 }
  0x13   : > { %p1704_p9 = pneg %p1703_p8 }
  0x15   : > { %p1709_p11 = pnand %p1707_p10, %p1704_p9 }
  0x17   : > { %1712 = shalt.err (!%p1709_p11)
}
  0x18   : > { %s1713_s25 = scalar_lea.vmem %s260_s13, 1024  ;;  %p1721_p1 = scmp.lt.s32.totalorder %s260_s13, %s260_s13 }
  0x19   : > { %p1714_p12 = scmp.ne.s32.totalorder %s260_s13, %s1713_s25  ;;  %p1722_p4 = scmp.lt.s32.totalorder %s1713_s25, %s1713_s25 }
  0x1b   : > { %p1716_p13 = pnand %p1714_p12, %p1702_p7  ;;  %p1723_p3 = por %p1722_p4, %p1721_p1 }
  0x1d   : > { %p1717_p0 = pneg %p1716_p13 }
  0x1f   : > { %p1724_p2 = pnand %p1723_p3, %p1717_p0 }
  0x21   : > { %1727 = shalt.err (!%p1724_p2)
}
  0x22   : > { %s1774_s26 = smov 256   ;;  %s1775_s27 = smov 16  }
  0x23   : > { %1550 = dma.hbm_to_vmem [thread:$0]  (!%p1851_p5), %s2005_s1, 1024, %s260_s13, [#allocation4], %s1774_s26, %s1774_s26, %s1775_s27  }
  0x24   : > { %s1728_s12 = scalar_lea.hbm %s2007_s3, 8192 }
  0x25   : > { %p1729_p6 = scmp.ne.s32.totalorder %s2007_s3, %s1728_s12  ;;  %p1735_p8 = scmp.lt.u32.totalorder %s1728_s12, %s2007_s3 }
  0x27   : > { %p1731_p2 = pnand %p1729_p6, %p1702_p7 }
  0x29   : > { %p1732_p3 = pneg %p1731_p2 }
  0x2b   : > { %p1737_p9 = pnand %p1735_p8, %p1732_p3 }
  0x2d   : > { %1740 = shalt.err (!%p1737_p9)
}
  0x2e   : > { %s1741_s13 = scalar_lea.vmem %s1855_s16, 8192  ;;  %p1749_p13 = scmp.lt.s32.totalorder %s1855_s16, %s1855_s16 }
  0x2f   : > { %p1742_p10 = scmp.ne.s32.totalorder %s1855_s16, %s1741_s13  ;;  %p1750_p0 = scmp.lt.s32.totalorder %s1741_s13, %s1741_s13 }
  0x31   : > { %p1744_p11 = pnand %p1742_p10, %p1702_p7  ;;  %p1751_p1 = por %p1750_p0, %p1749_p13 }
  0x33   : > { %p1745_p12 = pneg %p1744_p11 }
  0x35   : > { %p1752_p4 = pnand %p1751_p1, %p1745_p12 }
  0x37   : > { %1755 = shalt.err (!%p1752_p4)
}
  0x38   : > { %s1776_s21 = smov 128   ;;  %s1777_s22 = smov 8  }
  0x39   : > { %1553 = dma.hbm_to_vmem [thread:$0]  (!%p1851_p5), %s2007_s3, 8192, %s1855_s16, [#allocation6], %s1776_s21, %s1776_s21, %s1777_s22  }
  0x3a   : > { %p2018_p6 = scmp.ne.s32.totalorder %s2016_s8, 0 }
  0x3b   : > { %p2019_p7 = scmp.eq.s32.totalorder (!%p2018_p6), %s1838_s14, 0 }
  0x3c   : > { %315 = sbr.rel (%p2018_p6) target bundleno = 1036 (0x40c), region = 56 }
  0x43   : > { %1761 = dma.done.wait (%p2019_p7), [#allocation4], 1024   ;;  %p2020_p2 = pmov %p2019_p7 }
  0x45   : > { %1763 = vsyncadd (%p2020_p2), [#allocation4], 4294966272  ;;  %p2021_p3 = pmov %p2020_p2 }
  0x46   : > { %p2022_p8 = pmov %p2020_p2 }
  0x47   : > { %1765 = dma.done.wait (%p2021_p3), [#allocation6], 8192  }
  0x48   : > { %1767 = vsyncadd (%p2022_p8), [#allocation6], 4294959104  ;;  %s353_s17 = smul.u32 3, %s1838_s14  ;;  %v1778_v0 = vmov 0   ;;  %v1574_v1 = vld [vmem:[#allocation3 + $0x4] ss:$16 sps:$4 sm:$0xff]  }
  0x49   : > { %483 = vmatprep.mubr.bf16.mxu0 %v1778_v0  ;;  %v1576_v2 = vld [vmem:[#allocation3] ss:$16 sps:$4 sm:$0xff]   ;;  %451 = vmatprep.subr.bf16.mxu0 %v1574_v1  ;;  %v1577_v3 = vld [vmem:[#allocation3 + $0x24] ss:$16 sps:$4 sm:$0xff]   ;;  %v1583_v5 = vld [vmem:[#allocation3 + $0xc] ss:$16 sps:$4 sm:$0xff]  }
  0x4a   : > { %p354_p5 = scmp.lt.s32.totalorder %s353_s17, 5  ;;  %452 = vmatpush1.bf16.msra.mxu0 %v1576_v2  ;;  %v1579_v4 = vld [vmem:[#allocation3 + $0x20] ss:$16 sps:$4 sm:$0xff]   ;;  %v1581_v7 = vld [vmem:[#allocation3 + $0x8] ss:$16 sps:$4 sm:$0xff]   ;;  %vm444_vm0 = vcmask 261120  }
  0x4b   : > { %453 = vmatprep.subr.bf16.mxu0 %v1577_v3  ;;  %v1587_v8 = vld [vmem:[#allocation3 + $0x2c] ss:$16 sps:$4 sm:$0xff]   ;;  %v1590_v10 = vld [vmem:[#allocation5] ss:$8 sps:$4 sm:$0xff]   ;;  %v1593_v13 = vld [vmem:[#allocation5 + $0x10] ss:$8 sps:$4 sm:$0xff]  }
  0x4c   : > { %s2024_s17 = smov (!%p354_p5, %s353_s17), 5  ;;  %v1588_v9 = vld [vmem:[#allocation5 + $0x4] ss:$8 sps:$4 sm:$0xff]   ;;  %v1591_v11 = vld [vmem:[#allocation5 + $0x14] ss:$8 sps:$4 sm:$0xff]   ;;  %s1283_s27 = sld [smem:[#allocation2]] }
  0x4d   : > { %s1400_s8 = sshll.u32 %s2024_s17, 2  ;;  %969 = vmatprep.subr.bf16.mxu1 %v1588_v9  ;;  %v1585_v12 = vld [vmem:[#allocation3 + $0x28] ss:$16 sps:$4 sm:$0xff]   ;;  %v1594_v14 = vld [vmem:[#allocation5 + $0x24] ss:$8 sps:$4 sm:$0xff]   ;;  %p359_p9 = scmp.lt.s32.totalorder %s1838_s14, 1 }
  0x4e   : > { %s357_s26 = scalar_lea.vmem %s2004_s0, %s1400_s8  ;;  %454 = vmatpush1.bf16.msra.mxu0 %v1579_v4  ;;  %970 = vmatpush1.bf16.msra.mxu1 %v1590_v10  ;;  %v1596_v16 = vld [vmem:[#allocation5 + $0x20] ss:$8 sps:$4 sm:$0xff]   ;;  %v1604_v17 = vld [vmem:[#allocation5 + $0x104] ss:$8 sps:$4 sm:$0xff]   ;;  %v1597_v18 = vld [vmem:[#allocation5 + $0x34] ss:$8 sps:$4 sm:$0xff]  }
  0x4f   : > { %v1580_v6 = vld [vmem:[%s357_s26] sm:$0xff]   ;;  %502 = vmatprep.subr.bf16.mxu0 %v1583_v5  ;;  %971 = vmatprep.subr.bf16.mxu1 %v1591_v11  ;;  %v1584_v15 = vld [vmem:[%s357_s26 + $0x8] ss:$0 sps:$4 sm:$0xff]   ;;  %v1599_v19 = vld [vmem:[#allocation5 + $0x30] ss:$8 sps:$4 sm:$0xff]   ;;  %s2026_s14 = smov (!%p359_p9, %s1838_s14), 1 }
  0x50   : > { %v1600_v20 = vld [vmem:[#allocation5 + $0x44] ss:$8 sps:$4 sm:$0xff]   ;;  %v1602_v21 = vld [vmem:[#allocation5 + $0x100] ss:$8 sps:$4 sm:$0xff]   ;;  %v1606_v23 = vld [vmem:[#allocation5 + $0x54] ss:$8 sps:$4 sm:$0xff]   ;;  %s361_s30 = scalar_lea.vmem %s2013_s9, %s2026_s14 }
  0x51   : > { %1411 = vmatmul.mubr.msk.bf16.vlgmr.msra.gmra.mrb[0].mxu0 %vm444_vm0, %v1580_v6  ;;  %v1605_v22 = vld [vmem:[#allocation5 + $0x40] ss:$8 sps:$4 sm:$0xff]   ;;  %v1610_v24 = vld [vmem:[#allocation5 + $0x114] ss:$8 sps:$4 sm:$0xff]   ;;  %v1611_v25 = vld [vmem:[#allocation5 + $0x50] ss:$8 sps:$4 sm:$0xff]  }
  0x52   : > { %503 = vmatpush1.bf16.msra.mxu0 %v1581_v7  ;;  %493 = vmatprep.mubr.bf16.mxu0 %v1778_v0  ;;  %v1608_v26 = vld [vmem:[#allocation5 + $0x110] ss:$8 sps:$4 sm:$0xff]   ;;  %v1612_v27 = vld [vmem:[#allocation5 + $0x64] ss:$8 sps:$4 sm:$0xff]   ;;  %v1614_v29 = vld [vmem:[#allocation5 + $0x120] ss:$8 sps:$4 sm:$0xff]  }
  0x53   : > { %504 = vmatprep.subr.bf16.mxu0 %v1587_v8  ;;  %972 = vmatpush1.bf16.msra.mxu1 %v1593_v13  ;;  %v1616_v28 = vld [vmem:[#allocation5 + $0x124] ss:$8 sps:$4 sm:$0xff]   ;;  %v1617_v30 = vld [vmem:[#allocation5 + $0x60] ss:$8 sps:$4 sm:$0xff]   ;;  %v1618_v31 = vld [vmem:[#allocation5 + $0x74] ss:$8 sps:$4 sm:$0xff]  }
  0x54   : > { %973 = vmatprep.subr.bf16.mxu1 %v1594_v14  ;;  %v1622_v32 = vld [vmem:[#allocation5 + $0x134] ss:$8 sps:$4 sm:$0xff]   ;;  %v1623_v33 = vld [vmem:[#allocation5 + $0x70] ss:$8 sps:$4 sm:$0xff]   ;;  %v1624_v35 = vld [vmem:[#allocation5 + $0x84] ss:$8 sps:$4 sm:$0xff]  }
  0x55   : > { %v1620_v34 = vld [vmem:[#allocation5 + $0x130] ss:$8 sps:$4 sm:$0xff]   ;;  %v1628_v36 = vld [vmem:[#allocation5 + $0x144] ss:$8 sps:$4 sm:$0xff]   ;;  %v1626_v37 = vld [vmem:[#allocation5 + $0x140] ss:$8 sps:$4 sm:$0xff]  }
  0x56   : > { %505 = vmatpush1.bf16.msra.mxu0 %v1585_v12  ;;  %v1629_v38 = vld [vmem:[#allocation5 + $0x80] ss:$8 sps:$4 sm:$0xff]   ;;  %v1630_v39 = vld [vmem:[#allocation5 + $0x94] ss:$8 sps:$4 sm:$0xff]   ;;  %v1635_v41 = vld [vmem:[#allocation5 + $0x90] ss:$8 sps:$4 sm:$0xff]   ;;  %v376_v12 = vlaneseq }
  0x57   : > { %1020 = vmatprep.subr.bf16.mxu0 %v1604_v17  ;;  %974 = vmatpush1.bf16.msra.mxu1 %v1596_v16  ;;  %v1634_v40 = vld [vmem:[#allocation5 + $0x154] ss:$8 sps:$4 sm:$0xff]   ;;  %v1632_v42 = vld [vmem:[#allocation5 + $0x150] ss:$8 sps:$4 sm:$0xff]   ;;  %v1636_v43 = vld [vmem:[#allocation5 + $0xa4] ss:$8 sps:$4 sm:$0xff]  }
  0x58   : > { %975 = vmatprep.subr.bf16.mxu1 %v1597_v18  ;;  %v1640_v44 = vld [vmem:[#allocation5 + $0x164] ss:$8 sps:$4 sm:$0xff]   ;;  %v1641_v45 = vld [vmem:[#allocation5 + $0xa0] ss:$8 sps:$4 sm:$0xff]   ;;  %v1642_v47 = vld [vmem:[#allocation5 + $0xb4] ss:$8 sps:$4 sm:$0xff]  }
  0x59   : > { %1412 = vmatmul.mubr.msk.bf16.gmra.mrb[4].mxu0 %vm444_vm0, %v1584_v15  ;;  %v1638_v46 = vld [vmem:[#allocation5 + $0x160] ss:$8 sps:$4 sm:$0xff]   ;;  %v1646_v48 = vld [vmem:[#allocation5 + $0x174] ss:$8 sps:$4 sm:$0xff]   ;;  %v1647_v49 = vld [vmem:[#allocation5 + $0xb0] ss:$8 sps:$4 sm:$0xff]  }
  0x5a   : > { %534 = vmatprep.mubr.bf16.mxu0 %v1778_v0  ;;  %v1644_v50 = vld [vmem:[#allocation5 + $0x170] ss:$8 sps:$4 sm:$0xff]   ;;  %v1648_v51 = vld [vmem:[#allocation5 + $0xc4] ss:$8 sps:$4 sm:$0xff]   ;;  %v1653_v53 = vld [vmem:[#allocation5 + $0xc0] ss:$8 sps:$4 sm:$0xff]  }
  0x5b   : > { %976 = vmatpush1.bf16.msra.mxu1 %v1599_v19  ;;  %v1652_v52 = vld [vmem:[#allocation5 + $0x184] ss:$8 sps:$4 sm:$0xff]   ;;  %v1650_v54 = vld [vmem:[#allocation5 + $0x180] ss:$8 sps:$4 sm:$0xff]   ;;  %v1654_v55 = vld [vmem:[#allocation5 + $0xd4] ss:$8 sps:$4 sm:$0xff]  }
  0x5c   : > { %977 = vmatprep.subr.bf16.mxu1 %v1600_v20  ;;  %v1658_v56 = vld [vmem:[#allocation5 + $0x194] ss:$8 sps:$4 sm:$0xff]   ;;  %v1656_v57 = vld [vmem:[#allocation5 + $0x190] ss:$8 sps:$4 sm:$0xff]   ;;  %v1660_v59 = vld [vmem:[#allocation5 + $0xe4] ss:$8 sps:$4 sm:$0xff]  }
  0x5d   : > { %v1659_v58 = vld [vmem:[#allocation5 + $0xd0] ss:$8 sps:$4 sm:$0xff]   ;;  %v1664_v60 = vld [vmem:[#allocation5 + $0x1a4] ss:$8 sps:$4 sm:$0xff]   ;;  %v1662_v61 = vld [vmem:[#allocation5 + $0x1a0] ss:$8 sps:$4 sm:$0xff]  }
  0x5e   : > { %v1665_v62 = vld [vmem:[#allocation5 + $0xe0] ss:$8 sps:$4 sm:$0xff]   ;;  %v1666_v63 = vld [vmem:[#allocation5 + $0xf4] ss:$8 sps:$4 sm:$0xff]   ;;  %v1668_v1 = vld [vmem:[#allocation5 + $0x1b0] ss:$8 sps:$4 sm:$0xff]  }
  0x5f   : > { %978 = vmatpush1.bf16.msra.mxu1 %v1605_v22  ;;  %v1671_v2 = vld [vmem:[#allocation5 + $0xf0] ss:$8 sps:$4 sm:$0xff]   ;;  %v1674_v3 = vld [vmem:[#allocation5 + $0x1c4] ss:$8 sps:$4 sm:$0xff]   ;;  %v1672_v4 = vld [vmem:[#allocation5 + $0x1c0] ss:$8 sps:$4 sm:$0xff]  }
  0x60   : > { %979 = vmatprep.subr.bf16.mxu1 %v1606_v23  ;;  %v1677_v5 = vld [vmem:[#allocation5 + $0x1d4] ss:$8 sps:$4 sm:$0xff]   ;;  %v1680_v7 = vld [vmem:[#allocation5 + $0x1e4] ss:$8 sps:$4 sm:$0xff]   ;;  %v1678_v8 = vld [vmem:[#allocation5 + $0x1e0] ss:$8 sps:$4 sm:$0xff]  }
  0x61   : > { %1413 = vmatmul.mubr.msk.bf16.vlgmr.msra.gmra.mrb[8].mxu0 %vm444_vm0, %v1580_v6  ;;  %v1675_v6 = vld [vmem:[#allocation5 + $0x1d0] ss:$8 sps:$4 sm:$0xff]   ;;  %v1683_v9 = vld [vmem:[#allocation5 + $0x1f4] ss:$8 sps:$4 sm:$0xff]   ;;  %v1684_v11 = vld [vmem:[%s2009_s5 + $0x40] sm:$0xff]   ;;  %v1925_v13 = vshrl.u32 %v376_v12, 7 }
  0x62   : > { %544 = vmatprep.mubr.bf16.mxu0 %v1778_v0  ;;  %1021 = vmatpush1.bf16.msra.mxu0 %v1602_v21  ;;  %v1670_v0 = vld [vmem:[#allocation5 + $0x1b4] ss:$8 sps:$4 sm:$0xff]   ;;  %v1681_v10 = vld [vmem:[#allocation5 + $0x1f0] ss:$8 sps:$4 sm:$0xff]   ;;  %vm1320_vm1 = vcmask 188416  }
  0x63   : > { %1022 = vmatprep.subr.bf16.mxu0 %v1610_v24  ;;  %980 = vmatpush1.bf16.msra.mxu1 %v1611_v25  ;;  %v378_v14 = vsub.s32 0, %v1925_v13  ;;  %v382_v16 = vsub.s32 1, %v1925_v13  ;;  %v1690_v12 = vld [vmem:[%s2009_s5 + $0x58] sm:$0xff]  }
  0x64   : > { %981 = vmatprep.subr.bf16.mxu1 %v1612_v27 }
  0x66   : > { %1023 = vmatpush1.bf16.msra.mxu0 %v1608_v26 }
  0x67   : > { %1024 = vmatprep.subr.bf16.mxu0 %v1616_v28  ;;  %982 = vmatpush1.bf16.msra.mxu1 %v1617_v30 }
  0x68   : > { %983 = vmatprep.subr.bf16.mxu1 %v1618_v31 }
  0x69   : > { %1414 = vmatmul.mubr.msk.bf16.gmra.mrb[12].mxu0 %vm444_vm0, %v1584_v15  ;;  %v374_v15 = vld [vmem:[%s2006_s2] sm:$0xf] }
  0x6a   : > { %1025 = vmatpush1.bf16.msra.mxu0 %v1614_v29  ;;  %v379_v17 = vrot.slane %v374_v15, %v378_v14  ;;  %v383_v18 = vrot.slane %v374_v15, %v382_v16 }
  0x6b   : > { %1026 = vmatprep.subr.bf16.mxu0 %v1622_v32  ;;  %984 = vmatpush1.bf16.msra.mxu1 %v1623_v33 }
  0x6c   : > { %985 = vmatprep.subr.bf16.mxu1 %v1624_v35 }
  0x6e   : > { %1027 = vmatpush1.bf16.msra.mxu0 %v1620_v34  ;;  %v1685_v34 = vld [vmem:[%s2009_s5] sm:$0xff]  }
  0x6f   : > { %1028 = vmatprep.subr.bf16.mxu0 %v1628_v36  ;;  %986 = vmatpush1.bf16.msra.mxu1 %v1629_v38  ;;  %v1686_v38 = vld [vmem:[%s2009_s5 + $0x48] sm:$0xff]  }
  0x70   : > { %987 = vmatprep.subr.bf16.mxu1 %v1630_v39 }
  0x72   : > { %1029 = vmatpush1.bf16.msra.mxu0 %v1626_v37  ;;  %v386_v37 = vsub.s32 2, %v1925_v13 }
  0x73   : > { %1030 = vmatprep.subr.bf16.mxu0 %v1634_v40  ;;  %988 = vmatpush1.bf16.msra.mxu1 %v1635_v41  ;;  %v390_v41 = vsub.s32 3, %v1925_v13 }
  0x74   : > { %989 = vmatprep.subr.bf16.mxu1 %v1636_v43 }
  0x76   : > { %1031 = vmatpush1.bf16.msra.mxu0 %v1632_v42 }
  0x77   : > { %1032 = vmatprep.subr.bf16.mxu0 %v1640_v44  ;;  %990 = vmatpush1.bf16.msra.mxu1 %v1641_v45  ;;  %v387_v45 = vrot.slane %v374_v15, %v386_v37 }
  0x78   : > { %991 = vmatprep.subr.bf16.mxu1 %v1642_v47  ;;  %v391_v47 = vrot.slane %v374_v15, %v390_v41  ;;  %v1691_v15 = vld [vmem:[%s2009_s5 + $0x18] sm:$0xff]  }
  0x7a   : > { %1033 = vmatpush1.bf16.msra.mxu0 %v1638_v46 }
  0x7b   : > { %1034 = vmatprep.subr.bf16.mxu0 %v1646_v48  ;;  %992 = vmatpush1.bf16.msra.mxu1 %v1647_v49 }
  0x7c   : > { %993 = vmatprep.subr.bf16.mxu1 %v1648_v51 }
  0x7e   : > { %1035 = vmatpush1.bf16.msra.mxu0 %v1644_v50 }
  0x7f   : > { %1036 = vmatprep.subr.bf16.mxu0 %v1652_v52  ;;  %994 = vmatpush1.bf16.msra.mxu1 %v1653_v53 }
  0x80   : > { %995 = vmatprep.subr.bf16.mxu1 %v1654_v55 }
  0x82   : > { %1037 = vmatpush1.bf16.msra.mxu0 %v1650_v54 }
  0x83   : > { %1038 = vmatprep.subr.bf16.mxu0 %v1658_v56  ;;  %996 = vmatpush1.bf16.msra.mxu1 %v1659_v58 }
  0x84   : > { %997 = vmatprep.subr.bf16.mxu1 %v1660_v59 }
  0x86   : > { %1039 = vmatpush1.bf16.msra.mxu0 %v1656_v57 }
  0x87   : > { %1040 = vmatprep.subr.bf16.mxu0 %v1664_v60  ;;  %998 = vmatpush1.bf16.msra.mxu1 %v1665_v62 }
  0x88   : > { %999 = vmatprep.subr.bf16.mxu1 %v1666_v63 }
  0x8a   : > { %1041 = vmatpush1.bf16.msra.mxu0 %v1662_v61 }
  0x8b   : > { %1042 = vmatprep.subr.bf16.mxu0 %v1670_v0  ;;  %1000 = vmatpush1.bf16.msra.mxu1 %v1671_v2 }
  0x8c   : > { %1499 = vmatprep.subr.bf16.mxu1 %v1684_v11  ;;  %v1689_v11 = vld [vmem:[%s2009_s5 + $0x10] sm:$0xff]  }
  0x8e   : > { %1043 = vmatpush1.bf16.msra.mxu0 %v1668_v1 }
  0x8f   : > { %1044 = vmatprep.subr.bf16.mxu0 %v1674_v3 }
  0x92   : > { %1045 = vmatpush1.bf16.msra.mxu0 %v1672_v4 }
  0x93   : > { %1046 = vmatprep.subr.bf16.mxu0 %v1677_v5 }
  0x96   : > { %1047 = vmatpush1.bf16.msra.mxu0 %v1675_v6 }
  0x97   : > { %1048 = vmatprep.subr.bf16.mxu0 %v1680_v7 }
  0x9a   : > { %1049 = vmatpush1.bf16.msra.mxu0 %v1678_v8 }
  0x9b   : > { %1050 = vmatprep.subr.bf16.mxu0 %v1683_v9  ;;  %v1687_v9 = vld [vmem:[%s2009_s5 + $0x8] sm:$0xff]  }
  0x9e   : > { %1051 = vmatpush1.bf16.msra.mxu0 %v1681_v10  ;;  %v1688_v10 = vld [vmem:[%s2009_s5 + $0x50] sm:$0xff]  }
 0x124   : > { %v485_v19 = vpop.f32.mrb[0].mxu0 }
 0x125   : > { %v486_v20 = vadd.f32 %v485_v19, %v379_v17  ;;  %v487_v21 = vpop.f32.mrb[1].mxu0  ;;  %v1694_v19 = vld [vmem:[%s2009_s5 + $0x68] sm:$0xff]  }
 0x126   : > { %v488_v22 = vadd.f32 %v487_v21, %v383_v18  ;;  %v489_v23 = vpop.f32.mrb[2].mxu0  ;;  %v1696_v21 = vld [vmem:[%s2009_s5 + $0x70] sm:$0xff]  }
 0x127   : > { %v490_v24 = vadd.f32 %v489_v23, %v379_v17  ;;  %v491_v25 = vpop.f32.mrb[3].mxu0  ;;  %v553_v27 = vmax.f32 %v486_v20, 0.0  ;;  %v1695_v20 = vld [vmem:[%s2009_s5 + $0x28] sm:$0xff]   ;;  %v1698_v23 = vld [vmem:[%s2009_s5 + $0x78] sm:$0xff]  }
 0x128   : > { %v492_v26 = vadd.f32 %v491_v25, %v383_v18  ;;  %v554_v29 = vmax.f32 %v488_v22, 0.0  ;;  %v1697_v22 = vld [vmem:[%s2009_s5 + $0x30] sm:$0xff]  }
 0x129   : > { %v557_v28 = vmax.f32 %v490_v24, 0.0  ;;  %v1699_v24 = vld [vmem:[%s2009_s5 + $0x38] sm:$0xff]  }
 0x12a   : > { %v558_v30 = vmax.f32 %v492_v26, 0.0 }
 0x12b   : > { %v565_v31 = vpack.c.bf16 %v557_v28, %v553_v27 }
 0x12c   : > { %v495_v32 = vpop.f32.mrb[4].mxu0  ;;  %v566_v33 = vpack.c.bf16 %v558_v30, %v554_v29  ;;  %v637_v29 = vld [vmem:[%s2008_s4] sm:$0x3] }
 0x12d   : > { %v496_v35 = vadd.f32 %v495_v32, %v379_v17  ;;  %v497_v36 = vpop.f32.mrb[5].mxu0  ;;  %v1692_v17 = vld [vmem:[%s2009_s5 + $0x60] sm:$0xff]  }
 0x12e   : > { %v498_v39 = vadd.f32 %v497_v36, %v383_v18  ;;  %v499_v40 = vpop.f32.mrb[6].mxu0  ;;  %1001 = vmatprep.mubr.bf16.mxu1 %v566_v33  ;;  %v1693_v18 = vld [vmem:[%s2009_s5 + $0x20] sm:$0xff]   ;;  %v642_v33 = vrot.slane %v637_v29, %v378_v14 }
 0x12f   : > { %v500_v42 = vpop.f32.mrb[7].mxu0  ;;  %1002 = vmatmul.mubr.bf16.vlgmr.msra.gmra.mrb[0].mxu1 %v565_v31  ;;  %v561_v44 = vmax.f32 %v496_v35, 0.0  ;;  %v646_v35 = vrot.slane %v637_v29, %v382_v16 }
 0x130   : > { %v562_v43 = vmax.f32 %v498_v39, 0.0  ;;  %1500 = vmatpush3.bf16.msra.mxu1 %v1685_v34 }
 0x131   : > { %1501 = vmatprep.subr.bf16.mxu1 %v1686_v38  ;;  %v569_v49 = vpack.c.bf16 %v561_v44, %v561_v44 }
 0x132   : > { %v570_v46 = vpack.c.bf16 %v562_v43, %v562_v43 }
 0x134   : > { %v536_v48 = vpop.f32.mrb[8].mxu0  ;;  %1011 = vmatprep.mubr.bf16.mxu1 %v570_v46  ;;  %1502 = vmatpush3.bf16.msra.mxu1 %v1687_v9 }
 0x135   : > { %v537_v50 = vadd.f32 %v536_v48, %v387_v45  ;;  %v538_v51 = vpop.f32.mrb[9].mxu0  ;;  %1503 = vmatprep.subr.bf16.mxu1 %v1688_v10 }
 0x136   : > { %v539_v52 = vadd.f32 %v538_v51, %v391_v47  ;;  %v540_v53 = vpop.f32.mrb[10].mxu0 }
 0x137   : > { %v541_v54 = vadd.f32 %v540_v53, %v387_v45  ;;  %v542_v55 = vpop.f32.mrb[11].mxu0  ;;  %1012 = vmatmul.mubr.bf16.gmra.mrb[4].mxu1 %v569_v49  ;;  %v555_v57 = vmax.f32 %v537_v50, 0.0 }
 0x138   : > { %v543_v56 = vadd.f32 %v542_v55, %v391_v47  ;;  %v556_v59 = vmax.f32 %v539_v52, 0.0  ;;  %1504 = vmatpush3.bf16.msra.mxu1 %v1689_v11 }
 0x139   : > { %v559_v58 = vmax.f32 %v541_v54, 0.0  ;;  %1505 = vmatprep.subr.bf16.mxu1 %v1690_v12 }
 0x13a   : > { %v560_v60 = vmax.f32 %v543_v56, 0.0 }
 0x13b   : > { %v567_v61 = vpack.c.bf16 %v559_v58, %v555_v57 }
 0x13c   : > { %v568_v62 = vpack.c.bf16 %v560_v60, %v556_v59  ;;  %v546_v63 = vpop.f32.mrb[12].mxu0  ;;  %1506 = vmatpush3.bf16.msra.mxu1 %v1691_v15 }
 0x13d   : > { %v547_v0 = vadd.f32 %v546_v63, %v387_v45  ;;  %v548_v1 = vpop.f32.mrb[13].mxu0  ;;  %1507 = vmatprep.subr.bf16.mxu1 %v1692_v17 }
 0x13e   : > { %1052 = vmatprep.mubr.bf16.mxu0 %v568_v62  ;;  %v549_v2 = vadd.f32 %v548_v1, %v391_v47  ;;  %v550_v3 = vpop.f32.mrb[14].mxu0  ;;  %v1479_v1 = vld [vmem:[%s2010_s6] ss:$0 sm:$0xff] }
 0x13f   : > { %v563_v4 = vmax.f32 %v547_v0, 0.0  ;;  %1053 = vmatmul.mubr.bf16.vlgmr.msra.gmra.mrb[16].mxu0 %v567_v61  ;;  %v551_v5 = vpop.f32.mrb[15].mxu0 }
 0x140   : > { %v564_v6 = vmax.f32 %v549_v2, 0.0  ;;  %1508 = vmatpush3.bf16.msra.mxu1 %v1693_v18 }
 0x141   : > { %v571_v8 = vpack.c.bf16 %v563_v4, %v563_v4  ;;  %1509 = vmatprep.subr.bf16.mxu1 %v1694_v19 }
 0x142   : > { %v572_v7 = vpack.c.bf16 %v564_v6, %v564_v6 }
 0x144   : > { %1062 = vmatprep.mubr.bf16.mxu0 %v572_v7  ;;  %1510 = vmatpush3.bf16.msra.mxu1 %v1695_v20  ;;  %v1496_v7 = vld [vmem:[%s2011_s7] ss:$0 sm:$0xff] }
 0x145   : > { %1511 = vmatprep.subr.bf16.mxu1 %v1696_v21 }
 0x147   : > { %1063 = vmatmul.mubr.bf16.gmra.mrb[20].mxu0 %v571_v8 }
 0x148   : > { %1512 = vmatpush3.bf16.msra.mxu1 %v1697_v22 }
 0x149   : > { %1513 = vmatprep.subr.bf16.mxu1 %v1698_v23 }
 0x14c   : > { %1514 = vmatpush3.bf16.msra.mxu1 %v1699_v24  ;;  %v1284_v24 = vstv %s1283_s27 }
 0x202   : > { %v1003_v25 = vpop.f32.mrb[0].mxu1 }
 0x203   : > { %v1005_v26 = vpop.f32.mrb[1].mxu1  ;;  %v1004_v36 = vadd.f32 %v1003_v25, %v642_v33 }
 0x204   : > { %v1007_v27 = vpop.f32.mrb[2].mxu1  ;;  %v1006_v37 = vadd.f32 %v1005_v26, %v646_v35 }
 0x205   : > { %v1009_v28 = vpop.f32.mrb[3].mxu1  ;;  %v1008_v39 = vadd.f32 %v1007_v27, %v642_v33 }
 0x206   : > { %v1010_v42 = vadd.f32 %v1009_v28, %v646_v35 }
 0x20a   : > { %v1013_v30 = vpop.f32.mrb[4].mxu1 }
 0x20b   : > { %v1015_v31 = vpop.f32.mrb[5].mxu1  ;;  %v1014_v51 = vadd.f32 %v1013_v30, %v642_v33 }
 0x20c   : > { %v1017_v32 = vpop.f32.mrb[6].mxu1  ;;  %v1016_v13 = vadd.f32 %v1015_v31, %v646_v35 }
 0x20d   : > { %v1018_v34 = vpop.f32.mrb[7].mxu1 }
 0x212   : > { %v1054_v38 = vpop.f32.mrb[16].mxu0 }
 0x213   : > { %v1055_v40 = vadd.f32 %v1054_v38, %v1004_v36  ;;  %v1056_v41 = vpop.f32.mrb[17].mxu0 }
 0x214   : > { %v1057_v43 = vadd.f32 %v1056_v41, %v1006_v37  ;;  %v1058_v44 = vpop.f32.mrb[18].mxu0 }
 0x215   : > { %v1059_v45 = vadd.f32 %v1058_v44, %v1008_v39  ;;  %v1060_v46 = vpop.f32.mrb[19].mxu0  ;;  %v1071_v48 = vmax.f32 %v1055_v40, 0.0 }
 0x216   : > { %v1061_v47 = vadd.f32 %v1060_v46, %v1010_v42  ;;  %v1072_v50 = vmax.f32 %v1057_v43, 0.0 }
 0x217   : > { %v1073_v49 = vmax.f32 %v1059_v45, 0.0 }
 0x218   : > { %v1074_v14 = vmax.f32 %v1061_v47, 0.0 }
 0x219   : > { %v1077_v52 = vpack.c.bf16 %v1073_v49, %v1071_v48 }
 0x21a   : > { %v1078_v16 = vpack.c.bf16 %v1074_v14, %v1072_v50  ;;  %v1064_v53 = vpop.f32.mrb[20].mxu0 }
 0x21b   : > { %v1065_v54 = vadd.f32 %v1064_v53, %v1014_v51  ;;  %v1066_v55 = vpop.f32.mrb[21].mxu0 }
 0x21c   : > { %v1067_v56 = vadd.f32 %v1066_v55, %v1016_v13  ;;  %v1068_v57 = vpop.f32.mrb[22].mxu0  ;;  %1248 = vmatprep.mubr.bf16.mxu1 %v1078_v16 }
 0x21d   : > { %v1069_v58 = vpop.f32.mrb[23].mxu0  ;;  %1249 = vmatmul.mubr.bf16.vlgmr.msra.gmra.mrb[8].mxu1 %v1077_v52  ;;  %v1075_v60 = vmax.f32 %v1065_v54, 0.0 }
 0x21e   : > { %v1076_v59 = vmax.f32 %v1067_v56, 0.0 }
 0x21f   : > { %v1079_v62 = vpack.c.bf16 %v1075_v60, %v1075_v60 }
 0x220   : > { %v1080_v61 = vpack.c.bf16 %v1076_v59, %v1076_v59 }
 0x222   : > { %1256 = vmatprep.mubr.bf16.mxu1 %v1080_v61 }
 0x225   : > { %1257 = vmatmul.mubr.bf16.gmra.mrb[12].mxu1 %v1079_v62 }
 0x2f0   : > { %v1515_v63 = vpop.f32.mrb[8].mxu1 }
 0x2f1   : > { %v1516_v0 = vpop.f32.mrb[9].mxu1 }
 0x2f2   : > { %v1517_v2 = vadd.f32 %v1516_v0, %v1515_v63  ;;  %v1518_v3 = vpop.f32.mrb[10].mxu1 }
 0x2f3   : > { %v1519_v4 = vpop.f32.mrb[11].mxu1 }
 0x2f4   : > { %v1520_v5 = vadd.f32 %v1519_v4, %v1518_v3  ;;  %v1251_v6 = vadd.f32 %v1517_v2, %v1479_v1 }
 0x2f6   : > { %v1254_v8 = vadd.f32 %v1520_v5, %v1479_v1  ;;  %v1264_v9 = vmax.f32 %v1251_v6, 0.0 }
 0x2f8   : > { %v1265_v10 = vmax.f32 %v1254_v8, 0.0  ;;  %v1521_v11 = vpop.f32.mrb[12].mxu1  ;;  %v1274_v12 = vmul.f32 %v1496_v7, %v1264_v9 }
 0x2f9   : > { %v1522_v15 = vpop.f32.mrb[13].mxu1 }
 0x2fa   : > { %v1523_v17 = vadd.f32 %v1522_v15, %v1521_v11  ;;  %v1524_v18 = vpop.f32.mrb[14].mxu1  ;;  %1277 = vadd.xlane.f32.xlu0 %v1274_v12  ;;  %v1275_v20 = vmul.f32 %v1496_v7, %v1265_v10 }
 0x2fb   : > { %v1525_v19 = vpop.f32.mrb[15].mxu1 }
 0x2fc   : > { %v1259_v21 = vadd.f32 %v1523_v17, %v1479_v1 }
 0x2fe   : > { %1279 = vadd.xlane.f32.xlu0 %v1275_v20  ;;  %v1266_v22 = vmax.f32 %v1259_v21, 0.0 }
 0x300   : > { %v1276_v23 = vmul.f32 %v1496_v7, %v1266_v22 }
 0x302   : > { %1281 = vadd.xlane.f32.xlu1 %v1276_v23 }
 0x387   : > { %v1278_v25 = vpop.xlane.xlu0 %1277 }
 0x388   : > { %v1285_v26 = vadd.f32 %v1284_v24, %v1278_v25 }
 0x38a   : > { %1288 = vxpose.xlu1.b32.start [1/3] (short) (narrow) %v1285_v26, 8 }
 0x38b   : > { %v1280_v27 = vpop.xlane.xlu0 %1279 }
 0x38c   : > { %v1286_v28 = vadd.f32 %v1284_v24, %v1280_v27 }
 0x38e   : > { %1289 = vxpose.xlu1.b32.cont [2/3] (short) (narrow) %v1286_v28, 8 }
 0x38f   : > { %v1282_v29 = vpop.xlane.xlu1 %1281 }
 0x390   : > { %v1287_v30 = vadd.f32 %v1284_v24, %v1282_v29 }
 0x392   : > { %1290 = vxpose.xlu1.b32.end [3/3] (short) (narrow) %v1287_v30, 8 }
 0x40a   : > { %v1304_v31 = vpop.trf.xlu1 }
 0x40b   : > { %1321 = vst.msk [vmem:[%s361_s30] sm:$0x1] %vm1320_vm1, %v1304_v31 }
 0x40c PF: > { %s22_s11 = sadd.s32 1, %s1770_s11  }
 0x40d   : > { %p19_p10 = scmp.ge.s32.totalorder %s22_s11, 4  }
 0x40f   :  { %21 = sbr.rel (!%p19_p10) target bundleno = 4 (0x4), region = 95 }
 0x416   :  { %1339 = vsyncpa [#allocation4], 1 }
 0x417   :  { %1341 = vsyncpa [#allocation4 + $0x1], 1 }
 0x418   :  { %1342 = vsyncpa [#allocation6], 1 }

</bundles_post_ra>
